<compile_context>
chip_gen: v7x
topology: tpu7x:2x2x1
jax: 0.10.0
libtpu: 0.0.40
codegen_flags: <defaults>
</compile_context>

<pallas_src>
import functools
import math

import jax
import jax.numpy as jnp
from jax.experimental import pallas as pl
from jax.experimental.pallas import tpu as pltpu


def _mean_map_kernel(x_ref, o_ref, acc_ref, *, inv_c):
    """Channel mean over axis 1 of a (Bb, Ct, T) block.

    Grid axis 2 splits the channel axis ("arbitrary"); acc_ref is an f32 VMEM
    accumulator that persists across that axis.
    """
    ci = pl.program_id(2)

    @pl.when(ci == 0)
    def _init():
        acc_ref[...] = jnp.zeros_like(acc_ref)

    # Fused widen + reduce: accumulate in f32 without materializing an f32
    # copy of the whole input tile.
    acc_ref[...] += jnp.sum(x_ref[...], axis=1, keepdims=True, dtype=jnp.float32)

    @pl.when(ci == pl.num_programs(2) - 1)
    def _finalize():
        # inv_c is a Python float literal -> constant VPU multiply, no EUP divide.
        o_ref[...] = (acc_ref[...] * inv_c).astype(o_ref.dtype)


def _vmem_capacity_bytes():
    try:
        return int(pltpu.get_tpu_info().vmem_capacity_bytes)
    except Exception:
        # Interpret mode / older API: assume the smallest per-core VMEM (v7x).
        return 64 << 20


def _round_up(n, m):
    return -(-n // m) * m


def _pick_channel_tile(c, itemsize, budget):
    """Largest channel tile whose (Ct, 128) block fits the budget.

    If the whole channel axis fits, returns c (single in-kernel reduce).
    Otherwise returns a sublane-aligned divisor of c so partial channel blocks
    (which would sum garbage into the accumulator) never occur.
    """
    sub = 8 * max(1, 4 // itemsize)  # sublane multiple incl. dtype packing
    max_ct = budget // (128 * itemsize)
    if max_ct >= c:
        return c
    ct = (max_ct // sub) * sub
    while ct >= sub:
        if c % ct == 0:
            return ct
        ct -= sub
    # TODO(synk): mask a ragged channel tail instead of falling back to full C.
    return c


def mean_map(x):
    """Mean over axis 1 of an N-D tensor (N > 2) via a Pallas TPU kernel.

    Returns the same dtype as x for floating inputs; integer inputs return
    float32 (intentional divergence: torch.mean raises on integer dtypes).
    """
    assert x.ndim > 2, "MeanMap expects a tensor with more than 2 dims"
    B, C = int(x.shape[0]), int(x.shape[1])
    spatial = tuple(int(d) for d in x.shape[2:])
    HW = math.prod(spatial)

    out_dtype = x.dtype if jnp.issubdtype(x.dtype, jnp.floating) else jnp.float32
    itemsize = jnp.dtype(x.dtype).itemsize
    out_itemsize = jnp.dtype(out_dtype).itemsize

    # Lane-dense layout: flatten spatial dims into the last axis and pad it to
    # a 128-lane multiple so output stores are unmasked (padded lanes are zero
    # and sliced off afterwards; no-op for power-of-two feature maps).
    HW_pad = max(128, _round_up(HW, 128))
    x_flat = x.reshape(B, C, HW)
    if HW_pad != HW:
        x_flat = jnp.pad(x_flat, ((0, 0), (0, 0), (0, HW_pad - HW)))

    # Per-generation input-block budget: ~1/10 of per-core VMEM, capped at
    # 8 MiB, so double-buffered in/out blocks + the f32 accumulator + reduce
    # temporaries stay well inside 64 MiB (v7x) and 128 MiB (v5e/v6e).
    vmem_cap = _vmem_capacity_bytes()
    budget = max(256 * 1024, min(8 << 20, vmem_cap // 10))

    Ct = _pick_channel_tile(C, itemsize, budget)
    if Ct == C and C * HW_pad * itemsize <= budget:
        # Small feature maps: pack several batch elements per block so each
        # grid step issues one large DMA instead of being ~0.35us-overhead
        # bound on a few-KiB transfer.
        T = HW_pad
        Bb = min(B, max(1, budget // (C * HW_pad * itemsize)))
    elif Ct == C:
        # Whole-channel reduce per block; tile the flattened spatial axis.
        Bb = 1
        T = min(HW_pad, max(128, ((budget // (C * itemsize)) // 128) * 128))
    else:
        # Very large C: split channels across the trailing "arbitrary" axis.
        Bb = 1
        T = 128

    num_bt = pl.cdiv(B, Bb)
    num_t = pl.cdiv(HW_pad, T)
    num_c = pl.cdiv(C, Ct)
    # Megacore (v7x) shards the "parallel" axes; reduction axis stays last.
    grid = (num_bt, num_t, num_c)

    in_spec = pl.BlockSpec((Bb, Ct, T), lambda b, ti, ci: (b, ci, ti))
    out_spec = pl.BlockSpec((Bb, 1, T), lambda b, ti, ci: (b, 0, ti))

    # Explicit VMEM budget: 2x in (double buffer) + 2x out + accumulator
    # + f32 reduce temporary + slack.
    in_block = Bb * Ct * T * itemsize
    out_block = Bb * T * out_itemsize
    acc_block = Bb * T * 4
    needed = 2 * in_block + 2 * out_block + acc_block + 2 * in_block + (2 << 20)
    vmem_limit = int(min(vmem_cap, max(32 << 20, needed)))

    cost = pl.CostEstimate(
        flops=B * C * HW,
        transcendentals=0,
        bytes_accessed=B * C * HW * itemsize + B * HW * out_itemsize,
    )

    out = pl.pallas_call(
        functools.partial(_mean_map_kernel, inv_c=1.0 / C),
        out_shape=jax.ShapeDtypeStruct((B, 1, HW_pad), out_dtype),
        grid_spec=pltpu.PrefetchScalarGridSpec(
            num_scalar_prefetch=0,
            grid=grid,
            in_specs=[in_spec],
            out_specs=out_spec,
            scratch_shapes=[pltpu.VMEM((Bb, 1, T), jnp.float32)],
        ),
        compiler_params=pltpu.CompilerParams(
            dimension_semantics=("parallel", "parallel", "arbitrary"),
            vmem_limit_bytes=vmem_limit,
        ),
        cost_estimate=cost,
    )(x_flat)

    out = out[:, 0, :HW]
    return out.reshape((B,) + spatial)


if __name__ == "__main__":
    key = jax.random.PRNGKey(0)

    # Primary test: the module's nominal 4-D input (post-ReLU style values).
    B, C, H, W = 2, 4, 16, 16
    x = jax.nn.relu(jax.random.normal(key, (B, C, H, W), dtype=jnp.float32))
    out = jax.block_until_ready(mean_map(x))
    ref = jnp.mean(x, axis=1)
    assert out.shape == (B, H, W)
    assert out.dtype == x.dtype
    assert jnp.allclose(out, ref, atol=1e-6, rtol=1e-6), "mismatch vs reference"

    # Boundary-tile test: non-128-multiple flattened spatial extent (7x7=49)
    # exercises the lane-padding path.
    x2 = jax.nn.relu(jax.random.normal(jax.random.PRNGKey(1), (2, 4, 7, 7),
                                       dtype=jnp.float32))
    out2 = jax.block_until_ready(mean_map(x2))
    ref2 = jnp.mean(x2, axis=1)
    assert out2.shape == (2, 7, 7)
    assert jnp.allclose(out2, ref2, atol=1e-6, rtol=1e-6), "mismatch (odd HW)"

    print("KERNEL_OK")
</pallas_src>

<mosaic_0001>
module attributes {stable_mosaic.version = 11 : i64} {
  func.func @_mean_map_kernel(%arg0: i32, %arg1: i32, %arg2: i32, %arg3: memref<2x4x256xf32, #tpu.memory_space<vmem>>, %arg4: memref<2x1x256xf32, #tpu.memory_space<vmem>>, %arg5: memref<2x1x256xf32, #tpu.memory_space<vmem>>) attributes {dimension_semantics = [#tpu.dimension_semantics<parallel>, #tpu.dimension_semantics<parallel>, #tpu.dimension_semantics<arbitrary>], iteration_bounds = array<i64: 1, 1, 1>, scalar_prefetch = 0 : i64, scratch_operands = 1 : i64, tpu.core_type = #tpu.core_type<tc>, window_params = [{transform_indices = @transform_0, window_bounds = array<i64: 2, 4, 256>}, {transform_indices = @transform_1, window_bounds = array<i64: 2, 1, 256>}]} {
    %c0_i32 = arith.constant 0 : i32
    %0 = arith.cmpi eq, %arg2, %c0_i32 : i32
    %1 = arith.extui %0 : i1 to i32
    %c0_i32_0 = arith.constant 0 : i32
    %2 = arith.cmpi ne, %1, %c0_i32_0 : i32
    scf.if %2 {
      %cst_11 = arith.constant 0.000000e+00 : f32
      %12 = vector.broadcast %cst_11 : f32 to vector<2x1x256xf32>
      %c0_12 = arith.constant 0 : index
      %c0_13 = arith.constant 0 : index
      %c0_14 = arith.constant 0 : index
      %13 = vector.load %arg5[%c0_12, %c0_13, %c0_14] : memref<2x1x256xf32, #tpu.memory_space<vmem>>, vector<2x1x256xf32>
      tpu.vector_store %arg5[%c0_12, %c0_13, %c0_14], %12 {strides = array<i32>} : memref<2x1x256xf32, #tpu.memory_space<vmem>>, vector<2x1x256xf32>,
    } else {
    }
    %c0 = arith.constant 0 : index
    %c0_1 = arith.constant 0 : index
    %c0_2 = arith.constant 0 : index
    %3 = vector.load %arg5[%c0, %c0_1, %c0_2] : memref<2x1x256xf32, #tpu.memory_space<vmem>>, vector<2x1x256xf32>
    %c0_3 = arith.constant 0 : index
    %c0_4 = arith.constant 0 : index
    %c0_5 = arith.constant 0 : index
    %4 = vector.load %arg3[%c0_3, %c0_4, %c0_5] : memref<2x4x256xf32, #tpu.memory_space<vmem>>, vector<2x4x256xf32>
    %cst = arith.constant dense<0.000000e+00> : vector<2x256xf32>
    %5 = vector.multi_reduction <add>, %4, %cst [1] : vector<2x4x256xf32> to vector<2x256xf32>
    %6 = vector.shape_cast %5 : vector<2x256xf32> to vector<2x1x256xf32>
    %7 = arith.addf %3, %6 : vector<2x1x256xf32>
    %c0_6 = arith.constant 0 : index
    %c0_7 = arith.constant 0 : index
    %c0_8 = arith.constant 0 : index
    %8 = vector.load %arg5[%c0_6, %c0_7, %c0_8] : memref<2x1x256xf32, #tpu.memory_space<vmem>>, vector<2x1x256xf32>
    tpu.vector_store %arg5[%c0_6, %c0_7, %c0_8], %7 {strides = array<i32>} : memref<2x1x256xf32, #tpu.memory_space<vmem>>, vector<2x1x256xf32>,
    %c0_i32_9 = arith.constant 0 : i32
    %9 = arith.cmpi eq, %arg2, %c0_i32_9 : i32
    %10 = arith.extui %9 : i1 to i32
    %c0_i32_10 = arith.constant 0 : i32
    %11 = arith.cmpi ne, %10, %c0_i32_10 : i32
    scf.if %11 {
      %c0_11 = arith.constant 0 : index
      %c0_12 = arith.constant 0 : index
      %c0_13 = arith.constant 0 : index
      %12 = vector.load %arg5[%c0_11, %c0_12, %c0_13] : memref<2x1x256xf32, #tpu.memory_space<vmem>>, vector<2x1x256xf32>
      %cst_14 = arith.constant 2.500000e-01 : f32
      %13 = vector.broadcast %cst_14 : f32 to vector<2x1x256xf32>
      %14 = arith.mulf %12, %13 : vector<2x1x256xf32>
      %c0_15 = arith.constant 0 : index
      %c0_16 = arith.constant 0 : index
      %c0_17 = arith.constant 0 : index
      %15 = vector.load %arg4[%c0_15, %c0_16, %c0_17] : memref<2x1x256xf32, #tpu.memory_space<vmem>>, vector<2x1x256xf32>
      tpu.vector_store %arg4[%c0_15, %c0_16, %c0_17], %14 {strides = array<i32>} : memref<2x1x256xf32, #tpu.memory_space<vmem>>, vector<2x1x256xf32>,
    } else {
    }
    return
  }
  func.func @transform_0(%arg0: i32, %arg1: i32, %arg2: i32) -> (i32, i32, i32) {
    %c0_i32 = arith.constant 0 : i32
    return %arg0, %arg2, %arg1 : i32, i32, i32
  }
  func.func @transform_1(%arg0: i32, %arg1: i32, %arg2: i32) -> (i32, i32, i32) {
    %c0_i32 = arith.constant 0 : i32
    %c0_i32_0 = arith.constant 0 : i32
    return %arg0, %c0_i32, %arg1 : i32, i32, i32
  }
}

</mosaic_0001>

<bundles_post_ra>
// kernel: tpu_custom_call.1
= control target key start
LH: loop header
LB: loop body
LE: loop exit
PB: predicated region body
PF: predicated region fallthrough
CT: control target
= control target key end

     0   :  { %6 = vsyncpa [#allocation4], 0  ;;  %s258_s0 = inlined_call_operand.hbm [shape: f32[2,4,256], index: 0, kind: input, shape index: {}]   ;;  %s259_s1 = inlined_call_operand.hbm [shape: f32[2,1,256], index: 1, kind: output, shape index: {}]  }
   0x1   :  { %7 = vsyncpa [#allocation5], 0  ;;  %s200_s6 = smov [#allocation3]   ;;  %s152_s10 = scalar_lea.hbm %s258_s0, 256 }
   0x2   :  { %s13_s7 = sshll.u32 %s200_s6, 4  ;;  %p153_p0 = scmp.ne.s32.totalorder %s258_s0, %s152_s10  ;;  %s14_s7 = int_to_ptr.vmem [resolvable:$true] %s13_s7 }
   0x3   :  { %p156_p1 = scmp.lt.u32.totalorder %s152_s10, %s258_s0 }
   0x5   :  { %p158_p2 = pnand %p156_p1, %p153_p0 }
   0x7   :  { %161 = shalt.err (!%p158_p2)
}
   0x8   :  { %s162_s15 = scalar_lea.vmem %s14_s7, 256  ;;  %p167_p4 = scmp.lt.s32.totalorder %s14_s7, %s14_s7 }
   0x9   :  { %p163_p3 = scmp.ne.s32.totalorder %s14_s7, %s162_s15  ;;  %p168_p5 = scmp.lt.s32.totalorder %s162_s15, %s162_s15 }
   0xb   :  { %p169_p6 = por %p168_p5, %p167_p4 }
   0xd   :  { %p170_p7 = pnand %p169_p6, %p163_p3 }
   0xf   :  { %173 = shalt.err (!%p170_p7)
}
  0x10   :  { %s201_s16 = smov 128   ;;  %s202_s17 = smov 8  }
  0x11   :  { %19 = dma.hbm_to_vmem [thread:$0]  %s258_s0, 256, %s14_s7, [#allocation4], %s201_s16, %s201_s16, %s202_s17  }
  0x12   :  { %196 = dma.done.wait [#allocation4], 256  }
  0x13   :  { %197 = vsyncadd [#allocation4], 4294967040  ;;  %v27_v0 = vlaneseq  ;;  %v203_v2 = vmov 0.0   ;;  %vm43_vm1 = vcmask 1043456   ;;  %v35_v3 = vld [vmem:[#allocation3] sm:$0xff]  ;;  %v36_v4 = vld [vmem:[#allocation3 + $0x8] sm:$0xff] }
  0x14   :  { %v39_v5 = vcombine.high %v35_v3, %v35_v3  ;;  %v44_v6 = vsel %vm43_vm1, %v35_v3, 0.0  ;;  %v40_v7 = vcombine.high %v36_v4, %v36_v4  ;;  %v58_v8 = vsel %vm43_vm1, %v36_v4, 0.0  ;;  %s205_s0 = smov [#allocation6]  }
  0x15   :  { %vm230_vm0 = vcmp.lt.s32.totalorder %v27_v0, 256  ;;  %v45_v9 = vrot.slane %v44_v6, 4  ;;  %v59_v10 = vrot.slane %v58_v8, 4  ;;  %v204_v17 = vmov 1966171168   ;;  %s130_s20 = sshll.u32 %s205_s0, 4  ;;  %s131_s20 = int_to_ptr.vmem [resolvable:$true] %s130_s20 }
  0x16   :  { %31 = vst.msk [vmem:[#allocation2] sm:$0x3] %vm230_vm0, %v203_v2  ;;  %32 = vst.msk [vmem:[#allocation2 + $0x2] sm:$0x3] %vm230_vm0, %v203_v2  ;;  %v51_v11 = vsel %vm43_vm1, %v39_v5, 0.0  ;;  %v65_v12 = vsel %vm43_vm1, %v40_v7, 0.0  ;;  %v78_v18 = vunpack.c.l.s4 %v204_v17  ;;  %p179_p9 = scmp.lt.s32.totalorder %s131_s20, %s131_s20 }
  0x17   :  { %v46_v13 = vadd.f32 %v45_v9, %v44_v6  ;;  %v52_v14 = vrot.slane %v51_v11, 4  ;;  %v60_v15 = vadd.f32 %v59_v10, %v58_v8  ;;  %v66_v16 = vrot.slane %v65_v12, 4  ;;  %s174_s21 = scalar_lea.vmem %s131_s20, 64 }
  0x18   :  { %v79_v27 = vunpack.c.0.s8 %v78_v18  ;;  %v81_v28 = vshrl.u32 %v27_v0, 7  ;;  %p175_p8 = scmp.ne.s32.totalorder %s131_s20, %s174_s21  ;;  %p180_p10 = scmp.lt.s32.totalorder %s174_s21, %s174_s21 }
  0x19   :  { %v47_v19 = vrot.slane %v46_v13, 2  ;;  %v53_v20 = vadd.f32 %v52_v14, %v51_v11  ;;  %v61_v21 = vrot.slane %v60_v15, 2  ;;  %v67_v22 = vadd.f32 %v66_v16, %v65_v12 }
  0x1a   :  { %v82_v37 = vsub.s32 %v79_v27, %v81_v28  ;;  %p181_p11 = por %p180_p10, %p179_p9 }
  0x1b   :  { %v48_v23 = vadd.f32 %v47_v19, %v46_v13  ;;  %v54_v24 = vrot.slane %v53_v20, 2  ;;  %v62_v25 = vadd.f32 %v61_v21, %v60_v15  ;;  %v68_v26 = vrot.slane %v67_v22, 2 }
  0x1c   :  { %p182_p12 = pnand %p181_p11, %p175_p8 }
  0x1d   :  { %v49_v29 = vrot.slane %v48_v23, 1  ;;  %v55_v30 = vadd.f32 %v54_v24, %v53_v20  ;;  %v63_v31 = vrot.slane %v62_v25, 1  ;;  %v69_v32 = vadd.f32 %v68_v26, %v67_v22  ;;  %v33_v44 = vld [vmem:[#allocation2] sm:$0x3]  ;;  %v34_v45 = vld [vmem:[#allocation2 + $0x2] sm:$0x3] }
  0x1f   :  { %v50_v33 = vadd.f32 %v49_v29, %v48_v23  ;;  %v56_v34 = vrot.slane %v55_v30, 1  ;;  %v64_v35 = vadd.f32 %v63_v31, %v62_v25  ;;  %v70_v36 = vrot.slane %v69_v32, 1 }
  0x21   :  { %v57_v38 = vadd.f32 %v56_v34, %v55_v30  ;;  %v71_v39 = vadd.f32 %v70_v36, %v69_v32 }
  0x23   :  { %v76_v40 = vcombine.low %v50_v33, %v57_v38  ;;  %v91_v41 = vcombine.low %v64_v35, %v71_v39 }
  0x25   :  { %v83_v42 = vrot.slane %v76_v40, %v82_v37  ;;  %v98_v43 = vrot.slane %v91_v41, %v82_v37 }
  0x27   :  { %v90_v46 = vrot.slane %v83_v42, %v82_v37  ;;  %v105_v47 = vrot.slane %v98_v43, %v82_v37 }
  0x29   :  { %v108_v48 = vadd.f32 %v90_v46, %v33_v44  ;;  %v109_v49 = vadd.f32 %v105_v47, %v34_v45 }
  0x2b   :  { %114 = vst.msk [vmem:[#allocation2] sm:$0x3] %vm230_vm0, %v108_v48  ;;  %115 = vst.msk [vmem:[#allocation2 + $0x2] sm:$0x3] %vm230_vm0, %v109_v49 }
  0x32   :  { %v119_v50 = vld [vmem:[#allocation2] sm:$0x3]  ;;  %v120_v51 = vld [vmem:[#allocation2 + $0x2] sm:$0x3] }
  0x33   :  { %v121_v52 = vmul.f32 0.25, %v119_v50  ;;  %v122_v53 = vmul.f32 0.25, %v120_v51 }
  0x35   :  { %123 = vst.msk [vmem:[#allocation6] sm:$0x3] %vm230_vm0, %v121_v52  ;;  %124 = vst.msk [vmem:[#allocation6 + $0x2] sm:$0x3] %vm230_vm0, %v122_v53 }
  0x36   :  { %185 = shalt.err (!%p182_p12)
}
  0x37   :  { %s186_s24 = scalar_lea.hbm %s259_s1, 64 }
  0x38   :  { %p187_p13 = scmp.ne.s32.totalorder %s259_s1, %s186_s24  ;;  %p190_p0 = scmp.lt.u32.totalorder %s186_s24, %s259_s1 }
  0x3a   :  { %p192_p1 = pnand %p190_p0, %p187_p13 }
  0x3c   :  { %195 = shalt.err (!%p192_p1)
}
  0x3d   :  { %s206_s29 = smov 32   ;;  %s207_s30 = smov 2  }
  0x3e   :  { %136 = dma.vmem_to_hbm [thread:$0]  %s131_s20, 64, %s259_s1, [#allocation5], %s206_s29, %s206_s29, %s207_s30  }
  0x3f   :  { %198 = dma.done.wait [#allocation5], 64  }
  0x40   :  { %199 = vsyncadd [#allocation5], 4294967232 }
  0x41   :  { %140 = vsyncpa [#allocation4], 1 }
  0x42   :  { %141 = vsyncpa [#allocation5], 1 }

</bundles_post_ra>
